<compile_context>
chip_gen: v6e
topology: v6e:2x2x1
jax: 0.10.0
libtpu: 0.0.40
codegen_flags: <defaults>
</compile_context>

<pallas_src>
import jax
import jax.numpy as jnp
from jax.experimental import pallas as pl
from jax.experimental.pallas import tpu as pltpu

_SUBLANE = 8


def _round_up(n, m):
    return ((n + m - 1) // m) * m


def _mlp_kernel(x_ref, w1_ref, b1_ref, w2_ref, b2_ref, o_ref):
    # Fused hot path for one batch tile:
    #   matmul -> bias -> relu -> matmul -> bias -> relu
    x = x_ref[...]                                               # (TB, Din)
    h = jnp.dot(x, w1_ref[...], preferred_element_type=jnp.float32)
    h = jnp.maximum(h + b1_ref[...], 0.0)                        # f32 bias+ReLU (VPU)
    h = h.astype(w2_ref.dtype)                                   # back to MXU dtype
    y = jnp.dot(h, w2_ref[...], preferred_element_type=jnp.float32)
    y = jnp.maximum(y + b2_ref[...], 0.0)                        # (TB, Dout)
    o_ref[...] = y.astype(o_ref.dtype)


def basic_embedding_net(x, w1, b1, w2, b2, *, tile_b=None, compute_dtype=None,
                        out_dtype=None):
    """Fused embedding-net forward.

    x: (B, Din); w1: (Din, H); b1: (H,) or (1, H); w2: (H, Dout); b2: (Dout,) or (1, Dout).
    compute_dtype: MXU input dtype (e.g. jnp.bfloat16 on v6e/v7x).  Accumulation,
                   bias add and ReLU always happen in f32.
    out_dtype:     dtype of the returned array (defaults to x.dtype).
    """
    B, Din = x.shape
    Din_w, H = w1.shape
    H_w, Dout = w2.shape
    assert Din == Din_w and H == H_w, "weights must be (Din,H) and (H,Dout)"

    if compute_dtype is None:
        compute_dtype = x.dtype
    if out_dtype is None:
        out_dtype = x.dtype

    # ---- Batch tiling: near-equal tiles, multiples of 8 sublanes, even grid when >1.
    B8 = _round_up(B, _SUBLANE)
    if tile_b is None:
        target = 4096                                   # big tiles amortize ~0.35us/step
        num_tiles = max(1, -(-B8 // target))            # cdiv
        if num_tiles > 1 and num_tiles % 2:
            num_tiles += 1                              # even grid -> both v7x TCs
        tile_b = _round_up(-(-B8 // num_tiles), _SUBLANE)
    else:
        tile_b = max(_SUBLANE, _round_up(int(tile_b), _SUBLANE))
    B_p = _round_up(B8, tile_b)
    grid = (B_p // tile_b,)

    in_bytes = jnp.dtype(compute_dtype).itemsize
    out_bytes = jnp.dtype(out_dtype).itemsize

    # ---- Minimal wrapper-side data movement: cast only if needed, pad batch only.
    x_p = x.astype(compute_dtype) if x.dtype != compute_dtype else x
    if B_p != B:
        x_p = jnp.pad(x_p, ((0, B_p - B), (0, 0)))
    w1_c = w1.astype(compute_dtype) if w1.dtype != compute_dtype else w1
    w2_c = w2.astype(compute_dtype) if w2.dtype != compute_dtype else w2
    b1_c = b1.reshape(1, H).astype(jnp.float32)
    b2_c = b2.reshape(1, Dout).astype(jnp.float32)

    # ---- VMEM budget from the actual footprint (capped below v7x's 64 MiB physical).
    vmem_needed = (
        2 * tile_b * Din * in_bytes                 # double-buffered x tiles
        + 2 * tile_b * Dout * out_bytes             # double-buffered out tiles
        + 2 * (Din * H + H * Dout) * in_bytes       # resident weights (conservative 2x)
        + 4 * (H + Dout) * 4                        # biases
        + tile_b * (H + Dout) * 4                   # f32 intermediates
    )
    vmem_limit = int(min(max(2 * vmem_needed + (4 << 20), 16 << 20), 56 << 20))

    cost = pl.CostEstimate(
        flops=2 * B_p * (Din * H + H * Dout),
        transcendentals=0,
        bytes_accessed=(
            B_p * Din * in_bytes
            + (Din * H + H * Dout) * in_bytes
            + (H + Dout) * 4
            + B_p * Dout * out_bytes
        ),
    )

    # Full-dim feature blocks (block == full array dim on the lane axis is legal).
    x_spec = pl.BlockSpec((tile_b, Din), lambda i: (i, 0))
    out_spec = pl.BlockSpec((tile_b, Dout), lambda i: (i, 0))
    # Constant index_map -> weights/biases fetched once and kept resident in VMEM.
    resident_specs = [
        pl.BlockSpec((Din, H), lambda i: (0, 0)),
        pl.BlockSpec((1, H), lambda i: (0, 0)),
        pl.BlockSpec((H, Dout), lambda i: (0, 0)),
        pl.BlockSpec((1, Dout), lambda i: (0, 0)),
    ]

    out_p = pl.pallas_call(
        _mlp_kernel,
        out_shape=jax.ShapeDtypeStruct((B_p, Dout), out_dtype),
        grid_spec=pltpu.PrefetchScalarGridSpec(
            num_scalar_prefetch=0,
            grid=grid,
            in_specs=[x_spec] + resident_specs,
            out_specs=out_spec,
        ),
        compiler_params=pltpu.CompilerParams(
            dimension_semantics=("parallel",),
            vmem_limit_bytes=vmem_limit,
        ),
        cost_estimate=cost,
    )(x_p, w1_c, b1_c, w2_c, b2_c)

    return out_p if B_p == B else out_p[:B]


def reference(x, w1, b1, w2, b2):
    h = jnp.maximum(x @ w1 + b1.reshape(1, -1), 0.0)
    return jnp.maximum(h @ w2 + b2.reshape(1, -1), 0.0)


if __name__ == "__main__":
    # Small shapes consistent with the module's forward: x (batch, input_dim).
    batch, input_dim, hidden_dim, output_dim = 8, 16, 32, 16

    key = jax.random.PRNGKey(0)
    kx, kw1, kb1, kw2, kb2 = jax.random.split(key, 5)

    x = jax.random.normal(kx, (batch, input_dim), dtype=jnp.float32)
    # nn.Linear weight is (out, in); we keep the pre-transposed (in, out) layout.
    w1 = jax.random.normal(kw1, (input_dim, hidden_dim), dtype=jnp.float32) * 0.1
    b1 = jax.random.normal(kb1, (1, hidden_dim), dtype=jnp.float32) * 0.1
    w2 = jax.random.normal(kw2, (hidden_dim, output_dim), dtype=jnp.float32) * 0.1
    b2 = jax.random.normal(kb2, (1, output_dim), dtype=jnp.float32) * 0.1

    ref = reference(x, w1, b1, w2, b2)

    # 1) Default f32 path (no feature padding, single grid step at this tiny batch).
    out = jax.block_until_ready(basic_embedding_net(x, w1, b1, w2, b2))
    assert out.shape == (batch, output_dim)
    assert jnp.allclose(out, ref, atol=1e-5, rtol=1e-5)

    # 2) Ragged batch + explicit small tile -> grid > 1 (pipelined / megacore path).
    xr = jax.random.normal(kx, (20, input_dim), dtype=jnp.float32)
    out_r = jax.block_until_ready(basic_embedding_net(xr, w1, b1, w2, b2, tile_b=8))
    ref_r = reference(xr, w1, b1, w2, b2)
    assert out_r.shape == (20, output_dim)
    assert jnp.allclose(out_r, ref_r, atol=1e-5, rtol=1e-5)

    # 3) Spec-default tiny dims (input=hidden=output=3) to match the PyTorch module.
    x3 = jax.random.normal(kx, (5, 3), dtype=jnp.float32)
    w1_3 = jax.random.normal(kw1, (3, 3), dtype=jnp.float32) * 0.1
    b1_3 = jax.random.normal(kb1, (3,), dtype=jnp.float32) * 0.1
    w2_3 = jax.random.normal(kw2, (3, 3), dtype=jnp.float32) * 0.1
    b2_3 = jax.random.normal(kb2, (3,), dtype=jnp.float32) * 0.1
    out3 = jax.block_until_ready(basic_embedding_net(x3, w1_3, b1_3, w2_3, b2_3))
    ref3 = reference(x3, w1_3, b1_3, w2_3, b2_3)
    assert out3.shape == (5, 3)
    assert jnp.allclose(out3, ref3, atol=1e-5, rtol=1e-5)

    # 4) bf16 compute path (v6e/v7x HBM-traffic optimization), f32 accumulate.
    out_bf16 = jax.block_until_ready(
        basic_embedding_net(x, w1, b1, w2, b2, compute_dtype=jnp.bfloat16))
    assert jnp.allclose(out_bf16, ref, atol=5e-2, rtol=5e-2)

    print("KERNEL_OK")
</pallas_src>

<mosaic_0001>
module attributes {stable_mosaic.version = 11 : i64} {
  func.func @_mlp_kernel(%arg0: i32, %arg1: memref<8x16xf32, #tpu.memory_space<vmem>>, %arg2: memref<16x32xf32, #tpu.memory_space<vmem>>, %arg3: memref<1x32xf32, #tpu.memory_space<vmem>>, %arg4: memref<32x16xf32, #tpu.memory_space<vmem>>, %arg5: memref<1x16xf32, #tpu.memory_space<vmem>>, %arg6: memref<8x16xf32, #tpu.memory_space<vmem>>) attributes {dimension_semantics = [#tpu.dimension_semantics<parallel>], iteration_bounds = array<i64: 1>, scalar_prefetch = 0 : i64, scratch_operands = 0 : i64, tpu.core_type = #tpu.core_type<tc>, window_params = [{transform_indices = @transform_0, window_bounds = array<i64: 8, 16>}, {pipeline_mode = #tpu.pipeline_mode<synchronous>, transform_indices = @transform_1, window_bounds = array<i64: 16, 32>}, {pipeline_mode = #tpu.pipeline_mode<synchronous>, transform_indices = @transform_2, window_bounds = array<i64: 1, 32>}, {pipeline_mode = #tpu.pipeline_mode<synchronous>, transform_indices = @transform_3, window_bounds = array<i64: 32, 16>}, {pipeline_mode = #tpu.pipeline_mode<synchronous>, transform_indices = @transform_4, window_bounds = array<i64: 1, 16>}, {transform_indices = @transform_5, window_bounds = array<i64: 8, 16>}]} {
    %c0 = arith.constant 0 : index
    %c0_0 = arith.constant 0 : index
    %0 = vector.load %arg1[%c0, %c0_0] : memref<8x16xf32, #tpu.memory_space<vmem>>, vector<8x16xf32>
    %c0_1 = arith.constant 0 : index
    %c0_2 = arith.constant 0 : index
    %1 = vector.load %arg2[%c0_1, %c0_2] : memref<16x32xf32, #tpu.memory_space<vmem>>, vector<16x32xf32>
    %cst = arith.constant dense<0.000000e+00> : vector<8x32xf32>
    %2 = tpu.matmul %0, %1, %cst {dimension_numbers = #tpu.dot_dimension_numbers<[1], [0], [0], [1], [0, 0, 1, 1], [], []>} : vector<8x16xf32>, vector<16x32xf32>, vector<8x32xf32> -> vector<8x32xf32>
    %c0_3 = arith.constant 0 : index
    %c0_4 = arith.constant 0 : index
    %3 = vector.load %arg3[%c0_3, %c0_4] : memref<1x32xf32, #tpu.memory_space<vmem>>, vector<1x32xf32>
    %4 = vector.broadcast %3 : vector<1x32xf32> to vector<8x32xf32>
    %5 = arith.addf %2, %4 : vector<8x32xf32>
    %cst_5 = arith.constant 0.000000e+00 : f32
    %6 = vector.broadcast %cst_5 : f32 to vector<8x32xf32>
    %7 = arith.maximumf %5, %6 : vector<8x32xf32>
    %c0_6 = arith.constant 0 : index
    %c0_7 = arith.constant 0 : index
    %8 = vector.load %arg4[%c0_6, %c0_7] : memref<32x16xf32, #tpu.memory_space<vmem>>, vector<32x16xf32>
    %cst_8 = arith.constant dense<0.000000e+00> : vector<8x16xf32>
    %9 = tpu.matmul %7, %8, %cst_8 {dimension_numbers = #tpu.dot_dimension_numbers<[1], [0], [0], [1], [0, 0, 1, 1], [], []>} : vector<8x32xf32>, vector<32x16xf32>, vector<8x16xf32> -> vector<8x16xf32>
    %c0_9 = arith.constant 0 : index
    %c0_10 = arith.constant 0 : index
    %10 = vector.load %arg5[%c0_9, %c0_10] : memref<1x16xf32, #tpu.memory_space<vmem>>, vector<1x16xf32>
    %11 = vector.broadcast %10 : vector<1x16xf32> to vector<8x16xf32>
    %12 = arith.addf %9, %11 : vector<8x16xf32>
    %cst_11 = arith.constant 0.000000e+00 : f32
    %13 = vector.broadcast %cst_11 : f32 to vector<8x16xf32>
    %14 = arith.maximumf %12, %13 : vector<8x16xf32>
    %c0_12 = arith.constant 0 : index
    %c0_13 = arith.constant 0 : index
    %15 = vector.load %arg6[%c0_12, %c0_13] : memref<8x16xf32, #tpu.memory_space<vmem>>, vector<8x16xf32>
    tpu.vector_store %arg6[%c0_12, %c0_13], %14 {strides = array<i32>} : memref<8x16xf32, #tpu.memory_space<vmem>>, vector<8x16xf32>,
    return
  }
  func.func @transform_0(%arg0: i32) -> (i32, i32) {
    %c0_i32 = arith.constant 0 : i32
    %c0_i32_0 = arith.constant 0 : i32
    return %arg0, %c0_i32 : i32, i32
  }
  func.func @transform_1(%arg0: i32) -> (i32, i32) {
    %c0_i32 = arith.constant 0 : i32
    %c0_i32_0 = arith.constant 0 : i32
    %c0_i32_1 = arith.constant 0 : i32
    return %c0_i32, %c0_i32_0 : i32, i32
  }
  func.func @transform_2(%arg0: i32) -> (i32, i32) {
    %c0_i32 = arith.constant 0 : i32
    %c0_i32_0 = arith.constant 0 : i32
    %c0_i32_1 = arith.constant 0 : i32
    return %c0_i32, %c0_i32_0 : i32, i32
  }
  func.func @transform_3(%arg0: i32) -> (i32, i32) {
    %c0_i32 = arith.constant 0 : i32
    %c0_i32_0 = arith.constant 0 : i32
    %c0_i32_1 = arith.constant 0 : i32
    return %c0_i32, %c0_i32_0 : i32, i32
  }
  func.func @transform_4(%arg0: i32) -> (i32, i32) {
    %c0_i32 = arith.constant 0 : i32
    %c0_i32_0 = arith.constant 0 : i32
    %c0_i32_1 = arith.constant 0 : i32
    return %c0_i32, %c0_i32_0 : i32, i32
  }
  func.func @transform_5(%arg0: i32) -> (i32, i32) {
    %c0_i32 = arith.constant 0 : i32
    %c0_i32_0 = arith.constant 0 : i32
    return %arg0, %c0_i32 : i32, i32
  }
}

</mosaic_0001>

<bundles_post_ra>
// kernel: tpu_custom_call.1
= control target key start
LH: loop header
LB: loop body
LE: loop exit
PB: predicated region body
PF: predicated region fallthrough
CT: control target
= control target key end

     0   :  { %v262_v1 = vmov 0.0   ;;  %vm263_vm0 = vmmov 0   ;;  %s327_s0 = inlined_call_operand.vmem [shape: f32[8,16], index: 0, kind: input, shape index: {}]   ;;  %s328_s1 = inlined_call_operand.vmem [shape: f32[16,32], index: 1, kind: input, shape index: {}]   ;;  %s329_s2 = inlined_call_operand.vmem [shape: f32[1,32], index: 2, kind: input, shape index: {}]   ;;  %s330_s3 = inlined_call_operand.vmem [shape: f32[32,16], index: 3, kind: input, shape index: {}]   ;;  %s331_s4 = inlined_call_operand.vmem [shape: f32[1,16], index: 4, kind: input, shape index: {}]   ;;  %s332_s5 = inlined_call_operand.hbm [shape: f32[8,16], index: 5, kind: output, shape index: {}]  }
   0x1   :  { %v23_v0 = vld [vmem:[%s328_s1 + $0x8] sm:$0xff]  ;;  %219 = vmatprep.subr.mxu0 %v262_v1  ;;  %v22_v2 = vld [vmem:[%s328_s1] sm:$0xff]  ;;  %223 = vmatprep.mubr.msk.f32.mxu0 %vm263_vm0, %v262_v1  ;;  %v109_v3 = vld [vmem:[%s330_s3 + $0x18] sm:$0xff] }
   0x2   :  { %10 = vsyncpa [#allocation3], 0  ;;  %220 = vmatpush3.msra.mxu0 %v23_v0  ;;  %v21_v4 = vld [vmem:[%s327_s0] sm:$0xff]  ;;  %vm31_vm1 = vcmask 130048   ;;  %226 = vmatprep.subr.mxu1 %v262_v1  ;;  %v108_v5 = vld [vmem:[%s330_s3 + $0x10] sm:$0xff]  ;;  %vm117_vm2 = vcmask 261120  }
   0x3   :  { %221 = vmatprep.subr.mxu0 %v262_v1  ;;  %227 = vmatpush3.msra.mxu1 %v109_v3  ;;  %v107_v6 = vld [vmem:[%s330_s3 + $0x8] sm:$0xff]  ;;  %v106_v7 = vld [vmem:[%s330_s3] sm:$0xff]  ;;  %s264_s9 = smov [#allocation2]  }
   0x4   :  { %222 = vmatpush3.msra.mxu0 %v22_v2  ;;  %228 = vmatprep.subr.mxu1 %v262_v1  ;;  %v207_v8 = vld [vmem:[%s329_s2] ss:$0 sm:$0xff]  ;;  %s199_s10 = sshll.u32 %s264_s9, 4  ;;  %s200_s10 = int_to_ptr.vmem [resolvable:$true] %s199_s10 }
   0x5   :  { %224 = vmatmul.mubr.msk.f32.vlgmr.msra.gmra.mxu0 %vm31_vm1, %v21_v4  ;;  %234 = vmatprep.mubr.msk.f32.mxu1 %vm263_vm0, %v262_v1  ;;  %v209_v13 = vld [vmem:[%s331_s4] ss:$0 sm:$0xff]  ;;  %s240_s2 = scalar_lea.vmem %s200_s10, 128  ;;  %p245_p1 = scmp.lt.s32.totalorder %s200_s10, %s200_s10 }
   0x6   :  { %229 = vmatpush3.msra.mxu1 %v108_v5  ;;  %p241_p0 = scmp.ne.s32.totalorder %s200_s10, %s240_s2  ;;  %p246_p2 = scmp.lt.s32.totalorder %s240_s2, %s240_s2 }
   0x7   :  { %230 = vmatprep.subr.mxu1 %v262_v1 }
   0x8   :  { %231 = vmatpush3.msra.mxu1 %v107_v6  ;;  %p247_p3 = por %p246_p2, %p245_p1 }
   0x9   :  { %232 = vmatprep.subr.mxu1 %v262_v1 }
   0xa   :  { %233 = vmatpush3.msra.mxu1 %v106_v7  ;;  %p248_p4 = pnand %p247_p3, %p241_p0 }
  0xc5   :  { %v101_v9 = vpop.f32.mrf.mxu0 }
  0xc6   :  { %v102_v10 = vadd.f32 %v207_v8, %v101_v9 }
  0xc7   :  { %v225_v11 = vpop.f32.mrf.mxu0 }
  0xc8   :  { %v105_v12 = vmax.f32 %v102_v10, 0.0 }
  0xca   :  { %235 = vmatmul.mubr.msk.f32.vlgmr.msra.gmra.mxu1 %vm117_vm2, %v105_v12 }
 0x18a   :  { %v187_v14 = vpop.f32.mrf.mxu1 }
 0x18b   :  { %v188_v15 = vadd.f32 %v209_v13, %v187_v14 }
 0x18c   :  { %v236_v16 = vpop.f32.mrf.mxu1 }
 0x18d   :  { %v191_v17 = vmax.f32 %v188_v15, 0.0 }
 0x18f   :  { %192 = vst.msk [vmem:[#allocation2] sm:$0xff] %vm31_vm1, %v191_v17 }
 0x190   :  { %251 = shalt.err (!%p248_p4)
}
 0x191   :  { %202 = dma.vmem_to_hbm [thread:$0]  %s200_s10, 128, %s332_s5, [#allocation3]  }
 0x192   :  { %260 = dma.done.wait [#allocation3], 128  }
 0x193   :  { %261 = vsyncadd [#allocation3], 4294967168 }
 0x194   :  { %206 = vsyncpa [#allocation3], 1 }

</bundles_post_ra>
